<compile_context>
chip_gen: v5e
topology: v5e:2x2
jax: 0.10.0
libtpu: 0.0.40
codegen_flags: <defaults>
</compile_context>

<pallas_src>
import functools
from typing import NamedTuple

import jax
import jax.numpy as jnp
from jax.experimental import pallas as pl
from jax.experimental.pallas import tpu as pltpu


def _round_up(x, m):
    return ((x + m - 1) // m) * m


def _pad2d(a, shape):
    out = jnp.zeros(shape, jnp.float32)
    return out.at[: a.shape[0], : a.shape[1]].set(a.astype(jnp.float32))


def _vmem_capacity_bytes():
    """Per-core VMEM capacity; conservative fallback if the query fails."""
    try:
        info = pltpu.get_tpu_info()
        cap = getattr(info, "vmem_capacity_bytes", None)
        if cap:
            return int(cap)
    except Exception:
        pass
    return 64 * 1024 * 1024  # v7x per-TensorCore size: safe everywhere


class PredictHeadMeta(NamedTuple):
    d_feat: int
    num_points: int
    d: int            # num_points * d_feat (per input half)
    n_cls: int        # real class-logit width C
    dpad: int         # padded hidden width
    cpad: int         # padded class width
    out_w: int        # packed output lane width
    box_w: int        # lane width of the bbox fc3 block
    box_off: int      # lane offset of the 4 box outputs inside that block
    pack: bool        # cls and box share one 128-aligned output block


# ----------------------------- Pallas kernel --------------------------------
def _predict_head_kernel(pf_ref, sf_ref, w1a_ref, w1b_ref, w2_ref, wcb1_ref,
                         wb2_ref, wb3_ref, bias_ref, out_ref,
                         *, cpad, dpad, n_cls, box_w, pack):
    f32 = jnp.float32
    cdt = pf_ref.dtype                       # compute (MXU input) dtype, bf16

    bias = bias_ref[...]                     # (8, cpad + dpad) f32
    bcb1 = bias[0:1, :]                      # fused [class | bbox fc1] bias
    bb2 = bias[1:2, :dpad]                   # bbox fc2 bias
    bb3 = bias[2:3, :box_w]                  # bbox fc3 bias (pre-placed lanes)

    # combine_fcs: Linear(no bias) -> ReLU -> Linear(no bias) -> ReLU.
    # Split-K over the two concatenated halves (no HBM concat in the wrapper).
    h = jnp.dot(pf_ref[...], w1a_ref[...], preferred_element_type=f32)
    h = h + jnp.dot(sf_ref[...], w1b_ref[...], preferred_element_type=f32)
    h = jnp.maximum(h, 0.0).astype(cdt)
    h = jnp.maximum(jnp.dot(h, w2_ref[...], preferred_element_type=f32),
                    0.0).astype(cdt)

    # Fused class_embed | bbox-MLP layer 1 (shared K=d_feat -> one MXU pass).
    fused = jnp.dot(h, wcb1_ref[...], preferred_element_type=f32) + bcb1
    cls = fused[:, :cpad]                               # (TM, CPAD) f32
    bx = jnp.maximum(fused[:, cpad:], 0.0).astype(cdt)  # bbox fc1 + ReLU

    if not pack:
        # store cls early -> shorter live range of the fused temporary.
        out_ref[:, :cpad] = cls.astype(out_ref.dtype)

    # bbox layers 2, 3 + sigmoid (stable: 0.5*(tanh(z/2)+1), single EUP op).
    bx = jnp.maximum(
        jnp.dot(bx, wb2_ref[...], preferred_element_type=f32) + bb2, 0.0
    ).astype(cdt)
    z = jnp.dot(bx, wb3_ref[...], preferred_element_type=f32) + bb3
    box = 0.5 * (jnp.tanh(0.5 * z) + 1.0)

    if pack:
        # cls in lanes [0, n_cls), box in lanes [n_cls, n_cls+4): one unmasked
        # lane-dense store for the whole packed output block.
        lane = jax.lax.broadcasted_iota(jnp.int32, box.shape, 1)
        out_ref[...] = jnp.where(lane < n_cls, cls, box).astype(out_ref.dtype)
    else:
        out_ref[:, cpad:] = box.astype(out_ref.dtype)


# -------------------------- one-time parameter prep --------------------------
def prepare_params(params, *, d_feat, num_points, compute_dtype=jnp.bfloat16):
    """Pad / fuse / permute weights ONCE (hoisted out of the per-call path)."""
    (w1, w2, wc, bc, wb1, bb1, wb2, bb2, wb3, bb3) = params
    d = num_points * d_feat
    C = wc.shape[1]

    DPAD = _round_up(d_feat, 128)
    CPAD = _round_up(max(C, 1), 128)
    pack = (C + 4) <= CPAD                  # cls and box fit one padded block
    OUT_W = CPAD if pack else CPAD + 128
    BOX_W = OUT_W if pack else 128
    box_off = C if pack else 0

    wdt = compute_dtype
    w1a = _pad2d(w1[:d, :], (d, DPAD)).astype(wdt)       # combine fc1, pf rows
    w1b = _pad2d(w1[d:, :], (d, DPAD)).astype(wdt)       # combine fc1, sf rows
    w2p = _pad2d(w2, (DPAD, DPAD)).astype(wdt)           # combine fc2

    # fused [class_embed | bbox fc1] weight (shared input h).
    wcb1 = jnp.zeros((DPAD, CPAD + DPAD), jnp.float32)
    wcb1 = wcb1.at[:d_feat, :C].set(wc).at[:d_feat, CPAD:CPAD + d_feat].set(wb1)
    wcb1 = wcb1.astype(wdt)

    wb2p = _pad2d(wb2, (DPAD, DPAD)).astype(wdt)
    wb3p = jnp.zeros((DPAD, BOX_W), jnp.float32)
    wb3p = wb3p.at[:d_feat, box_off:box_off + 4].set(wb3).astype(wdt)

    # merged bias rows (kept f32: added to f32 accumulations).
    bias = jnp.zeros((8, CPAD + DPAD), jnp.float32)
    bias = bias.at[0, :C].set(bc[0]).at[0, CPAD:CPAD + d_feat].set(bb1[0])
    bias = bias.at[1, :d_feat].set(bb2[0])
    bias = bias.at[2, box_off:box_off + 4].set(bb3[0])

    arrays = (w1a, w1b, w2p, wcb1, wb2p, wb3p, bias)
    meta = PredictHeadMeta(d_feat=d_feat, num_points=num_points, d=d, n_cls=C,
                           dpad=DPAD, cpad=CPAD, out_w=OUT_W, box_w=BOX_W,
                           box_off=box_off, pack=pack)
    return arrays, meta


# ------------------------------ forward wrapper ------------------------------
def predict_head_forward(point_feature, position_feature, prep_arrays, meta,
                         *, tile_m=512, channels_last=False):
    """channels_last=False: torch-native (b, d_feat, num_object, num_points).
       channels_last=True : (b, num_object, num_points, d_feat) - skips the
       wrapper transpose (free reshape only)."""
    (w1a, w1b, w2p, wcb1, wb2p, wb3p, bias) = prep_arrays
    cdt = w1a.dtype
    if channels_last:
        b, num_object, num_points, d_feat = point_feature.shape
    else:
        b, d_feat, num_object, num_points = point_feature.shape
    assert d_feat == meta.d_feat and num_points == meta.num_points
    d, M = meta.d, b * num_object
    DPAD, CPAD, OUT_W = meta.dpad, meta.cpad, meta.out_w

    if channels_last:
        pf = point_feature.reshape(M, d).astype(cdt)
        sf = position_feature.reshape(M, d).astype(cdt)
    else:
        # TODO(synk): this permute is one extra HBM pass that cannot fuse into
        # the kernel; pass channels_last inputs to skip it.  The bf16 cast is
        # fused with it so its writeback is already halved.
        pf = jnp.transpose(point_feature, (0, 2, 3, 1)).reshape(M, d).astype(cdt)
        sf = jnp.transpose(position_feature, (0, 2, 3, 1)).reshape(M, d).astype(cdt)

    # ---- tile sizing against the actual per-generation VMEM capacity --------
    itemsize = jnp.dtype(cdt).itemsize
    weight_bytes = itemsize * (w1a.size + w1b.size + w2p.size + wcb1.size
                               + wb2p.size + wb3p.size) + 4 * bias.size
    weight_vmem = 2 * weight_bytes                       # pipeline double-buffer
    per_row = (2 * d * itemsize) * 2                     # pf + sf, double-buffered
    per_row += OUT_W * 4 * 2                             # f32 output, double-buffered
    per_row += (CPAD + 5 * DPAD + 2 * OUT_W) * 4         # in-kernel intermediates

    vmem_cap = _vmem_capacity_bytes()
    budget = int(0.55 * vmem_cap)                        # headroom for compiler scratch
    tm_cap = max(16, (budget - weight_vmem) // max(per_row, 1))
    tm_cap = max(16, (tm_cap // 16) * 16)                # bf16 sublane tile = 16
    tm = int(min(tile_m, tm_cap, _round_up(M, 16)))
    tm = max(16, (tm // 16) * 16)
    M_pad = _round_up(M, tm)

    if M_pad != M:
        pf = jnp.pad(pf, ((0, M_pad - M), (0, 0)))
        sf = jnp.pad(sf, ((0, M_pad - M), (0, 0)))

    need = weight_vmem + tm * per_row
    vmem_limit = int(min(vmem_cap,
                         max(32 * 1024 * 1024, int(need * 1.3) + (4 << 20))))

    full = lambda a: pl.BlockSpec(a.shape, lambda i: (0, 0))
    kernel = functools.partial(_predict_head_kernel, cpad=CPAD, dpad=DPAD,
                               n_cls=meta.n_cls, box_w=meta.box_w,
                               pack=meta.pack)

    out2d = pl.pallas_call(
        kernel,
        out_shape=jax.ShapeDtypeStruct((M_pad, OUT_W), jnp.float32),
        grid_spec=pltpu.PrefetchScalarGridSpec(
            num_scalar_prefetch=0,
            grid=(M_pad // tm,),
            in_specs=[
                pl.BlockSpec((tm, d), lambda i: (i, 0)),   # pf rows
                pl.BlockSpec((tm, d), lambda i: (i, 0)),   # sf rows
                full(w1a), full(w1b), full(w2p), full(wcb1),
                full(wb2p), full(wb3p), full(bias),
            ],
            out_specs=pl.BlockSpec((tm, OUT_W), lambda i: (i, 0)),
        ),
        compiler_params=pltpu.CompilerParams(
            dimension_semantics=("parallel",),
            vmem_limit_bytes=vmem_limit,
        ),
    )(pf, sf, w1a, w1b, w2p, wcb1, wb2p, wb3p, bias)

    C = meta.n_cls
    box_lo = C if meta.pack else CPAD
    outputs_cls = out2d[:M, :C].reshape(b, num_object, C)
    outputs_box = out2d[:M, box_lo:box_lo + 4].reshape(b, num_object, 4)
    return outputs_cls, outputs_box


# ------------------------- deterministic parameters --------------------------
def _xavier_uniform(key, fan_in, fan_out):
    bound = (6.0 / (fan_in + fan_out)) ** 0.5
    # Stored as (fan_in, fan_out) so the kernel computes x @ W (== torch x @ W.T).
    return jax.random.uniform(key, (fan_in, fan_out), jnp.float32, -bound, bound)


def make_params(key, d_feat, num_points, num_classes, use_focal=True):
    d_combine = num_points * (d_feat + d_feat)
    c_out = num_classes if use_focal else num_classes + 1
    keys = jax.random.split(key, 10)
    w1 = _xavier_uniform(keys[0], d_combine, d_feat)          # combine fc1, no bias
    w2 = _xavier_uniform(keys[1], d_feat, d_feat)             # combine fc2, no bias
    wc = _xavier_uniform(keys[2], d_feat, c_out)              # class_embed
    bc = (0.01 * jax.random.normal(keys[3], (1, c_out))).astype(jnp.float32)
    wb1 = _xavier_uniform(keys[4], d_feat, d_feat)            # bbox MLP l1
    bb1 = (0.01 * jax.random.normal(keys[5], (1, d_feat))).astype(jnp.float32)
    wb2 = _xavier_uniform(keys[6], d_feat, d_feat)            # bbox MLP l2
    bb2 = (0.01 * jax.random.normal(keys[7], (1, d_feat))).astype(jnp.float32)
    wb3 = _xavier_uniform(keys[8], d_feat, 4)                 # bbox MLP l3
    bb3 = (0.01 * jax.random.normal(keys[9], (1, 4))).astype(jnp.float32)
    return (w1, w2, wc, bc, wb1, bb1, wb2, bb2, wb3, bb3)


# --------------------------- pure-JAX reference -------------------------------
def _reference(point_feature, position_feature, params):
    b, d_feat, num_object, num_points = point_feature.shape
    d = num_points * d_feat
    pf = jnp.transpose(point_feature, (0, 2, 3, 1)).reshape(b, num_object, d)
    sf = jnp.transpose(position_feature, (0, 2, 3, 1)).reshape(b, num_object, d)
    x = jnp.concatenate([pf, sf], axis=-1)
    (w1, w2, wc, bc, wb1, bb1, wb2, bb2, wb3, bb3) = params
    h = jax.nn.relu(x @ w1)
    h = jax.nn.relu(h @ w2)
    cls = h @ wc + bc[0]
    bx = jax.nn.relu(h @ wb1 + bb1[0])
    bx = jax.nn.relu(bx @ wb2 + bb2[0])
    bx = jax.nn.sigmoid(bx @ wb3 + bb3[0])
    return cls, bx


# ---------------------------------- main --------------------------------------
if __name__ == "__main__":
    # Small config consistent with the module.
    batch = 2
    d_feat = 32          # HIDDEN_DIM
    num_object = 16      # number of proposals
    num_points = 4       # NUM_POINTS
    num_classes = 8      # NUM_CLASSES, USE_FOCAL=True

    key = jax.random.PRNGKey(0)
    k_pf, k_sf, k_par = jax.random.split(key, 3)
    point_feature = jax.random.normal(
        k_pf, (batch, d_feat, num_object, num_points), jnp.float32)
    position_feature = jax.random.normal(
        k_sf, (batch, d_feat, num_object, num_points), jnp.float32)

    params = make_params(k_par, d_feat, num_points, num_classes, use_focal=True)

    # One-time (hoisted) weight padding / fusion, bf16 MXU inputs.
    prep_arrays, meta = prepare_params(
        params, d_feat=d_feat, num_points=num_points,
        compute_dtype=jnp.bfloat16)

    fwd = jax.jit(lambda pf, sf, prep: predict_head_forward(
        pf, sf, prep, meta, tile_m=512))
    outputs_cls, outputs_box = fwd(point_feature, position_feature, prep_arrays)
    jax.block_until_ready((outputs_cls, outputs_box))

    ref_cls, ref_box = _reference(point_feature, position_feature, params)
    assert outputs_cls.shape == (batch, num_object, num_classes)
    assert outputs_box.shape == (batch, num_object, 4)
    # bf16 matmul inputs with f32 accumulation across 5 chained layers:
    # loosened (but comfortable) tolerances vs. the f32 reference.
    assert jnp.allclose(outputs_cls, ref_cls, atol=6e-2, rtol=6e-2)
    assert jnp.allclose(outputs_box, ref_box, atol=3e-2, rtol=3e-2)

    print("KERNEL_OK")
</pallas_src>

<mosaic_0001>
module attributes {stable_mosaic.version = 11 : i64} {
  func.func @_predict_head_kernel(%arg0: i32, %arg1: memref<32x128xbf16, #tpu.memory_space<vmem>>, %arg2: memref<32x128xbf16, #tpu.memory_space<vmem>>, %arg3: memref<128x128xbf16, #tpu.memory_space<vmem>>, %arg4: memref<128x128xbf16, #tpu.memory_space<vmem>>, %arg5: memref<128x128xbf16, #tpu.memory_space<vmem>>, %arg6: memref<128x256xbf16, #tpu.memory_space<vmem>>, %arg7: memref<128x128xbf16, #tpu.memory_space<vmem>>, %arg8: memref<128x128xbf16, #tpu.memory_space<vmem>>, %arg9: memref<8x256xf32, #tpu.memory_space<vmem>>, %arg10: memref<32x128xf32, #tpu.memory_space<vmem>>) attributes {dimension_semantics = [#tpu.dimension_semantics<parallel>], iteration_bounds = array<i64: 1>, scalar_prefetch = 0 : i64, scratch_operands = 0 : i64, tpu.core_type = #tpu.core_type<tc>, window_params = [{transform_indices = @transform_0, window_bounds = array<i64: 32, 128>}, {transform_indices = @transform_1, window_bounds = array<i64: 32, 128>}, {pipeline_mode = #tpu.pipeline_mode<synchronous>, transform_indices = @transform_2, window_bounds = array<i64: 128, 128>}, {pipeline_mode = #tpu.pipeline_mode<synchronous>, transform_indices = @transform_3, window_bounds = array<i64: 128, 128>}, {pipeline_mode = #tpu.pipeline_mode<synchronous>, transform_indices = @transform_4, window_bounds = array<i64: 128, 128>}, {pipeline_mode = #tpu.pipeline_mode<synchronous>, transform_indices = @transform_5, window_bounds = array<i64: 128, 256>}, {pipeline_mode = #tpu.pipeline_mode<synchronous>, transform_indices = @transform_6, window_bounds = array<i64: 128, 128>}, {pipeline_mode = #tpu.pipeline_mode<synchronous>, transform_indices = @transform_7, window_bounds = array<i64: 128, 128>}, {pipeline_mode = #tpu.pipeline_mode<synchronous>, transform_indices = @transform_8, window_bounds = array<i64: 8, 256>}, {transform_indices = @transform_9, window_bounds = array<i64: 32, 128>}]} {
    %c0 = arith.constant 0 : index
    %c0_0 = arith.constant 0 : index
    %0 = vector.load %arg9[%c0, %c0_0] : memref<8x256xf32, #tpu.memory_space<vmem>>, vector<8x256xf32>
    %1 = vector.extract_strided_slice %0 {offsets = [0, 0], sizes = [1, 256], strides = [1, 1]} : vector<8x256xf32> to vector<1x256xf32>
    %2 = vector.extract_strided_slice %0 {offsets = [1, 0], sizes = [1, 128], strides = [1, 1]} : vector<8x256xf32> to vector<1x128xf32>
    %3 = vector.extract_strided_slice %0 {offsets = [2, 0], sizes = [1, 128], strides = [1, 1]} : vector<8x256xf32> to vector<1x128xf32>
    %c0_1 = arith.constant 0 : index
    %c0_2 = arith.constant 0 : index
    %4 = vector.load %arg1[%c0_1, %c0_2] : memref<32x128xbf16, #tpu.memory_space<vmem>>, vector<32x128xbf16>
    %c0_3 = arith.constant 0 : index
    %c0_4 = arith.constant 0 : index
    %5 = vector.load %arg3[%c0_3, %c0_4] : memref<128x128xbf16, #tpu.memory_space<vmem>>, vector<128x128xbf16>
    %cst = arith.constant dense<0.000000e+00> : vector<32x128xf32>
    %6 = tpu.matmul %4, %5, %cst {dimension_numbers = #tpu.dot_dimension_numbers<[1], [0], [0], [1], [0, 0, 1, 1], [], []>} : vector<32x128xbf16>, vector<128x128xbf16>, vector<32x128xf32> -> vector<32x128xf32>
    %c0_5 = arith.constant 0 : index
    %c0_6 = arith.constant 0 : index
    %7 = vector.load %arg2[%c0_5, %c0_6] : memref<32x128xbf16, #tpu.memory_space<vmem>>, vector<32x128xbf16>
    %c0_7 = arith.constant 0 : index
    %c0_8 = arith.constant 0 : index
    %8 = vector.load %arg4[%c0_7, %c0_8] : memref<128x128xbf16, #tpu.memory_space<vmem>>, vector<128x128xbf16>
    %cst_9 = arith.constant dense<0.000000e+00> : vector<32x128xf32>
    %9 = tpu.matmul %7, %8, %cst_9 {dimension_numbers = #tpu.dot_dimension_numbers<[1], [0], [0], [1], [0, 0, 1, 1], [], []>} : vector<32x128xbf16>, vector<128x128xbf16>, vector<32x128xf32> -> vector<32x128xf32>
    %10 = arith.addf %6, %9 : vector<32x128xf32>
    %cst_10 = arith.constant 0.000000e+00 : f32
    %11 = vector.broadcast %cst_10 : f32 to vector<32x128xf32>
    %12 = arith.maximumf %10, %11 : vector<32x128xf32>
    %13 = arith.truncf %12 : vector<32x128xf32> to vector<32x128xbf16>
    %c0_11 = arith.constant 0 : index
    %c0_12 = arith.constant 0 : index
    %14 = vector.load %arg5[%c0_11, %c0_12] : memref<128x128xbf16, #tpu.memory_space<vmem>>, vector<128x128xbf16>
    %cst_13 = arith.constant dense<0.000000e+00> : vector<32x128xf32>
    %15 = tpu.matmul %13, %14, %cst_13 {dimension_numbers = #tpu.dot_dimension_numbers<[1], [0], [0], [1], [0, 0, 1, 1], [], []>} : vector<32x128xbf16>, vector<128x128xbf16>, vector<32x128xf32> -> vector<32x128xf32>
    %cst_14 = arith.constant 0.000000e+00 : f32
    %16 = vector.broadcast %cst_14 : f32 to vector<32x128xf32>
    %17 = arith.maximumf %15, %16 : vector<32x128xf32>
    %18 = arith.truncf %17 : vector<32x128xf32> to vector<32x128xbf16>
    %c0_15 = arith.constant 0 : index
    %c0_16 = arith.constant 0 : index
    %19 = vector.load %arg6[%c0_15, %c0_16] : memref<128x256xbf16, #tpu.memory_space<vmem>>, vector<128x256xbf16>
    %cst_17 = arith.constant dense<0.000000e+00> : vector<32x256xf32>
    %20 = tpu.matmul %18, %19, %cst_17 {dimension_numbers = #tpu.dot_dimension_numbers<[1], [0], [0], [1], [0, 0, 1, 1], [], []>} : vector<32x128xbf16>, vector<128x256xbf16>, vector<32x256xf32> -> vector<32x256xf32>
    %21 = vector.broadcast %1 : vector<1x256xf32> to vector<32x256xf32>
    %22 = arith.addf %20, %21 : vector<32x256xf32>
    %23 = vector.extract_strided_slice %22 {offsets = [0, 0], sizes = [32, 128], strides = [1, 1]} : vector<32x256xf32> to vector<32x128xf32>
    %24 = vector.extract_strided_slice %22 {offsets = [0, 128], sizes = [32, 128], strides = [1, 1]} : vector<32x256xf32> to vector<32x128xf32>
    %cst_18 = arith.constant 0.000000e+00 : f32
    %25 = vector.broadcast %cst_18 : f32 to vector<32x128xf32>
    %26 = arith.maximumf %24, %25 : vector<32x128xf32>
    %27 = arith.truncf %26 : vector<32x128xf32> to vector<32x128xbf16>
    %c0_19 = arith.constant 0 : index
    %c0_20 = arith.constant 0 : index
    %28 = vector.load %arg7[%c0_19, %c0_20] : memref<128x128xbf16, #tpu.memory_space<vmem>>, vector<128x128xbf16>
    %cst_21 = arith.constant dense<0.000000e+00> : vector<32x128xf32>
    %29 = tpu.matmul %27, %28, %cst_21 {dimension_numbers = #tpu.dot_dimension_numbers<[1], [0], [0], [1], [0, 0, 1, 1], [], []>} : vector<32x128xbf16>, vector<128x128xbf16>, vector<32x128xf32> -> vector<32x128xf32>
    %30 = vector.broadcast %2 : vector<1x128xf32> to vector<32x128xf32>
    %31 = arith.addf %29, %30 : vector<32x128xf32>
    %cst_22 = arith.constant 0.000000e+00 : f32
    %32 = vector.broadcast %cst_22 : f32 to vector<32x128xf32>
    %33 = arith.maximumf %31, %32 : vector<32x128xf32>
    %34 = arith.truncf %33 : vector<32x128xf32> to vector<32x128xbf16>
    %c0_23 = arith.constant 0 : index
    %c0_24 = arith.constant 0 : index
    %35 = vector.load %arg8[%c0_23, %c0_24] : memref<128x128xbf16, #tpu.memory_space<vmem>>, vector<128x128xbf16>
    %cst_25 = arith.constant dense<0.000000e+00> : vector<32x128xf32>
    %36 = tpu.matmul %34, %35, %cst_25 {dimension_numbers = #tpu.dot_dimension_numbers<[1], [0], [0], [1], [0, 0, 1, 1], [], []>} : vector<32x128xbf16>, vector<128x128xbf16>, vector<32x128xf32> -> vector<32x128xf32>
    %37 = vector.broadcast %3 : vector<1x128xf32> to vector<32x128xf32>
    %38 = arith.addf %36, %37 : vector<32x128xf32>
    %cst_26 = arith.constant 5.000000e-01 : f32
    %39 = vector.broadcast %cst_26 : f32 to vector<32x128xf32>
    %40 = arith.mulf %39, %38 : vector<32x128xf32>
    %41 = math.tanh %40 : vector<32x128xf32>
    %cst_27 = arith.constant 1.000000e+00 : f32
    %42 = vector.broadcast %cst_27 : f32 to vector<32x128xf32>
    %43 = arith.addf %41, %42 : vector<32x128xf32>
    %cst_28 = arith.constant 5.000000e-01 : f32
    %44 = vector.broadcast %cst_28 : f32 to vector<32x128xf32>
    %45 = arith.mulf %44, %43 : vector<32x128xf32>
    %46 = tpu.iota {dimensions = array<i32: 1>} : vector<32x128xi32>
    %c8_i32 = arith.constant 8 : i32
    %47 = vector.broadcast %c8_i32 : i32 to vector<32x128xi32>
    %48 = arith.cmpi slt, %46, %47 : vector<32x128xi32>
    %49 = arith.select %48, %23, %45 : vector<32x128xi1>, vector<32x128xf32>
    %c0_29 = arith.constant 0 : index
    %c0_30 = arith.constant 0 : index
    %50 = vector.load %arg10[%c0_29, %c0_30] : memref<32x128xf32, #tpu.memory_space<vmem>>, vector<32x128xf32>
    tpu.vector_store %arg10[%c0_29, %c0_30], %49 {strides = array<i32>} : memref<32x128xf32, #tpu.memory_space<vmem>>, vector<32x128xf32>,
    return
  }
  func.func @transform_0(%arg0: i32) -> (i32, i32) {
    %c0_i32 = arith.constant 0 : i32
    %c0_i32_0 = arith.constant 0 : i32
    return %arg0, %c0_i32 : i32, i32
  }
  func.func @transform_1(%arg0: i32) -> (i32, i32) {
    %c0_i32 = arith.constant 0 : i32
    %c0_i32_0 = arith.constant 0 : i32
    return %arg0, %c0_i32 : i32, i32
  }
  func.func @transform_2(%arg0: i32) -> (i32, i32) {
    %c0_i32 = arith.constant 0 : i32
    %c0_i32_0 = arith.constant 0 : i32
    %c0_i32_1 = arith.constant 0 : i32
    return %c0_i32, %c0_i32_0 : i32, i32
  }
  func.func @transform_3(%arg0: i32) -> (i32, i32) {
    %c0_i32 = arith.constant 0 : i32
    %c0_i32_0 = arith.constant 0 : i32
    %c0_i32_1 = arith.constant 0 : i32
    return %c0_i32, %c0_i32_0 : i32, i32
  }
  func.func @transform_4(%arg0: i32) -> (i32, i32) {
    %c0_i32 = arith.constant 0 : i32
    %c0_i32_0 = arith.constant 0 : i32
    %c0_i32_1 = arith.constant 0 : i32
    return %c0_i32, %c0_i32_0 : i32, i32
  }
  func.func @transform_5(%arg0: i32) -> (i32, i32) {
    %c0_i32 = arith.constant 0 : i32
    %c0_i32_0 = arith.constant 0 : i32
    %c0_i32_1 = arith.constant 0 : i32
    return %c0_i32, %c0_i32_0 : i32, i32
  }
  func.func @transform_6(%arg0: i32) -> (i32, i32) {
    %c0_i32 = arith.constant 0 : i32
    %c0_i32_0 = arith.constant 0 : i32
    %c0_i32_1 = arith.constant 0 : i32
    return %c0_i32, %c0_i32_0 : i32, i32
  }
  func.func @transform_7(%arg0: i32) -> (i32, i32) {
    %c0_i32 = arith.constant 0 : i32
    %c0_i32_0 = arith.constant 0 : i32
    %c0_i32_1 = arith.constant 0 : i32
    return %c0_i32, %c0_i32_0 : i32, i32
  }
  func.func @transform_8(%arg0: i32) -> (i32, i32) {
    %c0_i32 = arith.constant 0 : i32
    %c0_i32_0 = arith.constant 0 : i32
    %c0_i32_1 = arith.constant 0 : i32
    return %c0_i32, %c0_i32_0 : i32, i32
  }
  func.func @transform_9(%arg0: i32) -> (i32, i32) {
    %c0_i32 = arith.constant 0 : i32
    %c0_i32_0 = arith.constant 0 : i32
    return %arg0, %c0_i32 : i32, i32
  }
}

</mosaic_0001>

<bundles_post_ra>
// kernel: _lambda_.1
= control target key start
LH: loop header
LB: loop body
LE: loop exit
PB: predicated region body
PF: predicated region fallthrough
CT: control target
= control target key end

     0   :  { %14 = vsyncpa [#allocation3], 0  ;;  %s1036_s12 = smov [#allocation2]   ;;  %s1037_s14 = smov 64   ;;  %s1338_s0 = inlined_call_operand.vmem [shape: bf16[32,128], index: 0, kind: input, shape index: {}]   ;;  %s1339_s1 = inlined_call_operand.vmem [shape: bf16[32,128], index: 1, kind: input, shape index: {}]   ;;  %s1340_s2 = inlined_call_operand.vmem [shape: bf16[128,128], index: 2, kind: input, shape index: {}]   ;;  %s1341_s3 = inlined_call_operand.vmem [shape: bf16[128,128], index: 3, kind: input, shape index: {}]   ;;  %s1342_s4 = inlined_call_operand.vmem [shape: bf16[128,128], index: 4, kind: input, shape index: {}]   ;;  %s1343_s5 = inlined_call_operand.vmem [shape: bf16[128,256], index: 5, kind: input, shape index: {}]   ;;  %s1344_s6 = inlined_call_operand.vmem [shape: bf16[128,128], index: 6, kind: input, shape index: {}]   ;;  %s1345_s7 = inlined_call_operand.hbm [shape: bf16[128,128], index: 7, kind: input, shape index: {}]   ;;  %s1346_s8 = inlined_call_operand.vmem [shape: f32[8,256], index: 8, kind: input, shape index: {}]   ;;  %s1347_s9 = inlined_call_operand.vmem [shape: f32[32,128], index: 9, kind: output, shape index: {}]  }
   0x1   :  { %s33_s11 = sshll.u32 %s1345_s7, 4  ;;  %s35_s13 = sshll.u32 %s1036_s12, 4  ;;  %s34_s11 = int_to_ptr.hbm [resolvable:$true] %s33_s11  ;;  %s36_s13 = int_to_ptr.vmem [resolvable:$true] %s35_s13 }
   0x2   :  { %s1038_s15 = smov 4  }
   0x3   :  { %41 = dma.hbm_to_vmem [thread:$0]  %s34_s11, 1024, %s36_s13, [#allocation3], %s1037_s14, %s1037_s14, %s1038_s15  }
   0x4   :  { %1034 = dma.done.wait [#allocation3], 1024  }
   0x5   :  { %1035 = vsyncadd [#allocation3], 4294966272  ;;  %v950_v0 = vld [vmem:[%s1341_s3 + $0x38] sm:$0xff]  ;;  %v949_v2 = vld [vmem:[%s1341_s3 + $0x30] sm:$0xff] }
   0x6   :  { %v940_v1 = vld [vmem:[%s1340_s2 + $0x38] sm:$0xff]  ;;  %150 = vmatpush.bf16.msra.mxu0 %v950_v0  ;;  %v939_v3 = vld [vmem:[%s1340_s2 + $0x30] sm:$0xff]  ;;  %v948_v4 = vld [vmem:[%s1341_s3 + $0x28] sm:$0xff] }
   0x7   :  { %229 = vmatpush.bf16.msra.mxu1 %v940_v1  ;;  %v938_v5 = vld [vmem:[%s1340_s2 + $0x28] sm:$0xff]  ;;  %v947_v6 = vld [vmem:[%s1341_s3 + $0x20] sm:$0xff]  ;;  %v946_v8 = vld [vmem:[%s1341_s3 + $0x18] sm:$0xff] }
   0x8   :  { %v937_v7 = vld [vmem:[%s1340_s2 + $0x20] sm:$0xff]  ;;  %v936_v9 = vld [vmem:[%s1340_s2 + $0x18] sm:$0xff]  ;;  %v945_v11 = vld [vmem:[%s1341_s3 + $0x10] sm:$0xff] }
   0x9   :  { %v958_v10 = vld [vmem:[%s1342_s4 + $0x38] sm:$0xff]  ;;  %v935_v12 = vld [vmem:[%s1340_s2 + $0x10] sm:$0xff]  ;;  %v944_v14 = vld [vmem:[%s1341_s3 + $0x8] sm:$0xff] }
   0xa   :  { %151 = vmatpush.bf16.msra.mxu0 %v949_v2  ;;  %318 = vmatpush.bf16.msra.mxu2 %v958_v10  ;;  %v957_v13 = vld [vmem:[%s1342_s4 + $0x30] sm:$0xff]  ;;  %v934_v15 = vld [vmem:[%s1340_s2 + $0x8] sm:$0xff]  ;;  %v943_v17 = vld [vmem:[%s1341_s3] sm:$0xff] }
   0xb   :  { %230 = vmatpush.bf16.msra.mxu1 %v939_v3  ;;  %v956_v16 = vld [vmem:[%s1342_s4 + $0x28] sm:$0xff]  ;;  %v933_v18 = vld [vmem:[%s1340_s2] sm:$0xff]  ;;  %v954_v24 = vld [vmem:[%s1342_s4 + $0x18] sm:$0xff] }
   0xc   :  { %v955_v19 = vld [vmem:[%s1342_s4 + $0x20] sm:$0xff]  ;;  %v942_v22 = vld [vmem:[%s1339_s1 + $0x8] sm:$0xff]  ;;  %v953_v25 = vld [vmem:[%s1342_s4 + $0x10] sm:$0xff] }
   0xd   :  { %v941_v20 = vld [vmem:[%s1339_s1] sm:$0xff]  ;;  %v932_v23 = vld [vmem:[%s1338_s0 + $0x8] sm:$0xff]  ;;  %v861_v28 = vld [vmem:[%s1343_s5 + $0x70] sm:$0xf] }
   0xe   :  { %152 = vmatpush.bf16.msra.mxu0 %v948_v4  ;;  %319 = vmatpush.bf16.msra.mxu2 %v957_v13  ;;  %v931_v21 = vld [vmem:[%s1338_s0] sm:$0xff]  ;;  %v952_v26 = vld [vmem:[%s1342_s4 + $0x8] sm:$0xff]  ;;  %v974_v29 = vld [vmem:[%s1343_s5 + $0x74] sm:$0xf0] }
   0xf   :  { %231 = vmatpush.bf16.msra.mxu1 %v938_v5  ;;  %v951_v27 = vld [vmem:[%s1342_s4] sm:$0xff]  ;;  %v973_v30 = vld [vmem:[%s1343_s5 + $0x74] sm:$0xf]  ;;  %v862_v33 = vor.u32 %v974_v29, %v861_v28  ;;  %v863_v34 = vld [vmem:[%s1343_s5 + $0x78] sm:$0xf0] }
  0x10   :  { %v853_v35 = vld [vmem:[%s1343_s5 + $0x60] sm:$0xf]  ;;  %v972_v36 = vld [vmem:[%s1343_s5 + $0x64] sm:$0xf0]  ;;  %v1194_v37 = vor.u32 %v973_v30, %v863_v34  ;;  %v971_v38 = vld [vmem:[%s1343_s5 + $0x64] sm:$0xf] }
  0x11   :  { %v855_v39 = vld [vmem:[%s1343_s5 + $0x68] sm:$0xf0]  ;;  %441 = vmatpush.bf16.msra.mxu3 %v862_v33  ;;  %v854_v40 = vor.u32 %v972_v36, %v853_v35  ;;  %v845_v42 = vld [vmem:[%s1343_s5 + $0x50] sm:$0xf]  ;;  %v970_v43 = vld [vmem:[%s1343_s5 + $0x54] sm:$0xf0] }
  0x12   :  { %153 = vmatpush.bf16.msra.mxu0 %v947_v6  ;;  %320 = vmatpush.bf16.msra.mxu2 %v956_v16  ;;  %v1203_v41 = vor.u32 %v971_v38, %v855_v39  ;;  %v969_v44 = vld [vmem:[%s1343_s5 + $0x54] sm:$0xf]  ;;  %v847_v45 = vld [vmem:[%s1343_s5 + $0x58] sm:$0xf0]  ;;  %v846_v46 = vor.u32 %v970_v43, %v845_v42  ;;  %v837_v49 = vld [vmem:[%s1343_s5 + $0x40] sm:$0xf] }
  0x13   :  { %232 = vmatpush.bf16.msra.mxu1 %v937_v7  ;;  %v850_v48 = vor.u32 %v969_v44, %v847_v45  ;;  %v968_v50 = vld [vmem:[%s1343_s5 + $0x44] sm:$0xf0]  ;;  %v967_v53 = vld [vmem:[%s1343_s5 + $0x44] sm:$0xf]  ;;  %v839_v54 = vld [vmem:[%s1343_s5 + $0x48] sm:$0xf0] }
  0x14   :  { %v838_v56 = vor.u32 %v968_v50, %v837_v49  ;;  %v842_v59 = vor.u32 %v967_v53, %v839_v54  ;;  %v829_v60 = vld [vmem:[%s1343_s5 + $0x30] sm:$0xf]  ;;  %v966_v61 = vld [vmem:[%s1343_s5 + $0x34] sm:$0xf0]  ;;  %v965_v62 = vld [vmem:[%s1343_s5 + $0x34] sm:$0xf] }
  0x15   :  { %442 = vmatpush.bf16.msra.mxu3 %v854_v40  ;;  %v831_v63 = vld [vmem:[%s1343_s5 + $0x38] sm:$0xf0]  ;;  %v830_v1 = vor.u32 %v966_v61, %v829_v60  ;;  %v964_v13 = vld [vmem:[%s1343_s5 + $0x24] sm:$0xf0]  ;;  %v823_v16 = vld [vmem:[%s1343_s5 + $0x28] sm:$0xf0] }
  0x16   :  { %154 = vmatpush.bf16.msra.mxu0 %v946_v8  ;;  %321 = vmatpush.bf16.msra.mxu2 %v955_v19  ;;  %v834_v2 = vor.u32 %v965_v62, %v831_v63  ;;  %v962_v19 = vld [vmem:[%s1343_s5 + $0x14] sm:$0xf0]  ;;  %v807_v28 = vld [vmem:[%s1343_s5 + $0x8] sm:$0xf0]  ;;  %v981_v36 = vld [vmem:[%s1344_s6 + $0x30] sm:$0xff] }
  0x17   :  { %233 = vmatpush.bf16.msra.mxu1 %v936_v9  ;;  %v982_v35 = vld [vmem:[%s1344_s6 + $0x38] sm:$0xff]  ;;  %v980_v38 = vld [vmem:[%s1344_s6 + $0x28] sm:$0xff]  ;;  %v979_v39 = vld [vmem:[%s1344_s6 + $0x20] sm:$0xff] }
  0x18   :  { %v978_v44 = vld [vmem:[%s1344_s6 + $0x18] sm:$0xff]  ;;  %v977_v45 = vld [vmem:[%s1344_s6 + $0x10] sm:$0xff]  ;;  %v988_v62 = vld [vmem:[#allocation2 + $0x28] sm:$0xff] }
  0x19   :  { %443 = vmatpush.bf16.msra.mxu3 %v846_v46  ;;  %v976_v46 = vld [vmem:[%s1344_s6 + $0x8] sm:$0xff]  ;;  %v989_v61 = vld [vmem:[#allocation2 + $0x30] sm:$0xff] }
  0x1a   :  { %155 = vmatpush.bf16.msra.mxu0 %v945_v11  ;;  %322 = vmatpush.bf16.msra.mxu2 %v954_v24  ;;  %v805_v24 = vld [vmem:[%s1343_s5] sm:$0xf] }
  0x1b   :  { %234 = vmatpush.bf16.msra.mxu1 %v935_v12  ;;  %v821_v12 = vld [vmem:[%s1343_s5 + $0x20] sm:$0xf] }
  0x1d   :  { %444 = vmatpush.bf16.msra.mxu3 %v838_v56 }
  0x1e   :  { %156 = vmatpush.bf16.msra.mxu0 %v944_v14  ;;  %323 = vmatpush.bf16.msra.mxu2 %v953_v25  ;;  %v963_v14 = vld [vmem:[%s1343_s5 + $0x24] sm:$0xf]  ;;  %v960_v25 = vld [vmem:[%s1343_s5 + $0x4] sm:$0xf0] }
  0x1f   :  { %235 = vmatpush.bf16.msra.mxu1 %v934_v15  ;;  %v822_v15 = vor.u32 %v964_v13, %v821_v12  ;;  %v48_v13 = vld [vmem:[%s1346_s8] sm:$0xff] }
  0x21   :  { %445 = vmatpush.bf16.msra.mxu3 %v830_v1 }
  0x22   :  { %157 = vmatpush.bf16.msra.mxu0 %v943_v17  ;;  %324 = vmatpush.bf16.msra.mxu2 %v952_v26  ;;  %v826_v17 = vor.u32 %v963_v14, %v823_v16  ;;  %v959_v26 = vld [vmem:[%s1343_s5 + $0x4] sm:$0xf]  ;;  %v501_v14 = vperm.slane %v48_v13, 1 }
  0x23   :  { %236 = vmatpush.bf16.msra.mxu1 %v933_v18  ;;  %v813_v18 = vld [vmem:[%s1343_s5 + $0x10] sm:$0xf]  ;;  %v810_v29 = vor.u32 %v959_v26, %v807_v28  ;;  %v591_v28 = vperm.slane %v48_v13, 2 }
  0x25   :  { %158 = vmatmul.bf16.vlgmr.msra.gmra.mxu0 %v941_v20  ;;  %v961_v20 = vld [vmem:[%s1343_s5 + $0x14] sm:$0xf]  ;;  %446 = vmatpush.bf16.msra.mxu3 %v822_v15 }
  0x26   :  { %237 = vmatmul.bf16.vlgmr.msra.gmra.mxu1 %v931_v21  ;;  %325 = vmatpush.bf16.msra.mxu2 %v951_v27  ;;  %v814_v21 = vor.u32 %v962_v19, %v813_v18  ;;  %v806_v27 = vor.u32 %v960_v25, %v805_v24 }
  0x27   :  { %460 = vmatpush.bf16.msrb.mxu0 %v1194_v37  ;;  %550 = vmatpush.bf16.msrb.mxu1 %v982_v35 }
  0x29   :  { %447 = vmatpush.bf16.msra.mxu3 %v814_v21 }
  0x2b   :  { %461 = vmatpush.bf16.msrb.mxu0 %v1203_v41  ;;  %551 = vmatpush.bf16.msrb.mxu1 %v981_v36  ;;  %v359_v36 = vperm.slane %v48_v13, 0 }
  0x2d   :  { %448 = vmatpush.bf16.msra.mxu3 %v806_v27 }
  0x2f   :  { %462 = vmatpush.bf16.msrb.mxu0 %v850_v48  ;;  %552 = vmatpush.bf16.msrb.mxu1 %v980_v38 }
  0x31   :  { %991 = vmatpush.bf16.msrb.mxu3 %v1194_v37 }
  0x33   :  { %463 = vmatpush.bf16.msrb.mxu0 %v842_v59  ;;  %553 = vmatpush.bf16.msrb.mxu1 %v979_v39 }
  0x35   :  { %163 = vmatmul.bf16.gmra.mxu0 %v942_v22  ;;  %v815_v22 = vld [vmem:[%s1343_s5 + $0x18] sm:$0xf0]  ;;  %992 = vmatpush.bf16.msrb.mxu3 %v1203_v41 }
  0x36   :  { %242 = vmatmul.bf16.gmra.mxu1 %v932_v23  ;;  %v818_v23 = vor.u32 %v961_v20, %v815_v22 }
  0x37   :  { %464 = vmatpush.bf16.msrb.mxu0 %v834_v2  ;;  %554 = vmatpush.bf16.msrb.mxu1 %v978_v44 }
  0x39   :  { %993 = vmatpush.bf16.msrb.mxu3 %v850_v48  ;;  %v49_v48 = vld [vmem:[%s1346_s8 + $0x8] sm:$0xff] }
  0x3a   :  { %v360_v50 = vperm.slane %v49_v48, 0 }
  0x3b   :  { %465 = vmatpush.bf16.msrb.mxu0 %v826_v17  ;;  %555 = vmatpush.bf16.msrb.mxu1 %v977_v45 }
  0x3d   :  { %994 = vmatpush.bf16.msrb.mxu3 %v842_v59  ;;  %v990_v59 = vld [vmem:[#allocation2 + $0x38] sm:$0xff] }
  0x3e   :  { %640 = vmatpush.bf16.msrb.mxu2 %v990_v59 }
  0x3f   :  { %466 = vmatpush.bf16.msrb.mxu0 %v818_v23  ;;  %556 = vmatpush.bf16.msrb.mxu1 %v976_v46 }
  0x41   :  { %995 = vmatpush.bf16.msrb.mxu3 %v834_v2 }
  0x42   :  { %641 = vmatpush.bf16.msrb.mxu2 %v989_v61 }
  0x43   :  { %467 = vmatpush.bf16.msrb.mxu0 %v810_v29 }
  0x45   :  { %996 = vmatpush.bf16.msrb.mxu3 %v826_v17 }
  0x46   :  { %642 = vmatpush.bf16.msrb.mxu2 %v988_v62 }
  0x49   :  { %997 = vmatpush.bf16.msrb.mxu3 %v818_v23 }
  0x4d   :  { %998 = vmatpush.bf16.msrb.mxu3 %v810_v29 }
  0xa2   :  { %v159_v31 = vpop.f32.mrf.mxu0 }
  0xa3   :  { %v238_v32 = vpop.f32.mrf.mxu1 }
  0xa4   :  { %v239_v47 = vadd.f32 %v238_v32, %v159_v31 }
  0xa6   :  { %v248_v57 = vmax.f32 %v239_v47, 0.0  ;;  %v975_v47 = vld [vmem:[%s1344_s6] sm:$0xff] }
  0xa7   :  { %557 = vmatpush.bf16.msrb.mxu1 %v975_v47 }
  0xaa   :  { %v161_v51 = vpop.f32.mrf.mxu0 }
  0xab   :  { %v240_v52 = vpop.f32.mrf.mxu1 }
  0xac   :  { %v241_v55 = vadd.f32 %v240_v52, %v161_v51 }
  0xae   :  { %v249_v58 = vmax.f32 %v241_v55, 0.0 }
  0xb0   :  { %v252_v0 = vpack.c.bf16 %v249_v58, %v248_v57 }
  0xb2   :  { %326 = vmatmul.bf16.vlgmr.msra.gmra.mxu2 %v252_v0  ;;  %v164_v3 = vpop.f32.mrf.mxu0  ;;  %v987_v0 = vld [vmem:[#allocation2 + $0x20] sm:$0xff] }
  0xb3   :  { %v243_v4 = vpop.f32.mrf.mxu1  ;;  %643 = vmatpush.bf16.msrb.mxu2 %v987_v0 }
  0xb4   :  { %v244_v5 = vadd.f32 %v243_v4, %v164_v3 }
  0xb6   :  { %v250_v9 = vmax.f32 %v244_v5, 0.0 }
  0xba   :  { %v166_v6 = vpop.f32.mrf.mxu0 }
  0xbb   :  { %v245_v7 = vpop.f32.mrf.mxu1 }
  0xbc   :  { %v246_v8 = vadd.f32 %v245_v7, %v166_v6 }
  0xbe   :  { %v251_v10 = vmax.f32 %v246_v8, 0.0  ;;  %v986_v8 = vld [vmem:[#allocation2 + $0x18] sm:$0xff] }
  0xbf   :  { %644 = vmatpush.bf16.msrb.mxu2 %v986_v8 }
  0xc0   :  { %v253_v11 = vpack.c.bf16 %v251_v10, %v250_v9  ;;  %v985_v9 = vld [vmem:[#allocation2 + $0x10] sm:$0xff]  ;;  %v984_v10 = vld [vmem:[#allocation2 + $0x8] sm:$0xff] }
  0xc2   :  { %331 = vmatmul.bf16.gmra.mxu2 %v253_v11  ;;  %v983_v11 = vld [vmem:[#allocation2] sm:$0xff] }
  0xc3   :  { %645 = vmatpush.bf16.msrb.mxu2 %v985_v9 }
  0xc7   :  { %646 = vmatpush.bf16.msrb.mxu2 %v984_v10 }
  0xcb   :  { %647 = vmatpush.bf16.msrb.mxu2 %v983_v11 }
 0x135   :  { %v327_v30 = vpop.f32.mrf.mxu2 }
 0x136   :  { %v337_v32 = vmax.f32 %v327_v30, 0.0 }
 0x13d   :  { %v329_v31 = vpop.f32.mrf.mxu2 }
 0x13e   :  { %v338_v33 = vmax.f32 %v329_v31, 0.0 }
 0x140   :  { %v341_v34 = vpack.c.bf16 %v338_v33, %v337_v32  ;;  %v675_v32 = vlaneseq }
 0x142   :  { %449 = vmatmul.bf16.vlgmr.msra.gmra.mxu3 %v341_v34  ;;  %468 = vmatmul.bf16.vlgmr.msrb.gmra.mxu0 %v341_v34  ;;  %v676_v34 = vand.u32 127, %v675_v32 }
 0x144   :  { %vm677_vm0 = vcmp.lt.s32.totalorder %v676_v34, 8 }
 0x145   :  { %v332_v37 = vpop.f32.mrf.mxu2 }
 0x146   :  { %v339_v41 = vmax.f32 %v332_v37, 0.0 }
 0x14d   :  { %v334_v40 = vpop.f32.mrf.mxu2 }
 0x14e   :  { %v340_v42 = vmax.f32 %v334_v40, 0.0 }
 0x150   :  { %v342_v43 = vpack.c.bf16 %v340_v42, %v339_v41 }
 0x152   :  { %454 = vmatmul.bf16.gmra.mxu3 %v342_v43 }
 0x162   :  { %473 = vmatmul.bf16.vlgmr.msrb.gmra.mxu3 %v342_v43 }
 0x1bf   :  { %v469_v49 = vpop.f32.mrf.mxu0 }
 0x1c0   :  { %v470_v52 = vadd.f32 %v469_v49, %v360_v50 }
 0x1c2   :  { %v479_v55 = vmax.f32 %v470_v52, 0.0 }
 0x1c5   :  { %v1307_v51 = vpop.f32.mrf.mxu3 }
 0x1c6   :  { %v451_v40 = vadd.f32 %v1307_v51, %v359_v36 }
 0x1c7   :  { %v471_v53 = vpop.f32.mrf.mxu0 }
 0x1c8   :  { %v472_v54 = vadd.f32 %v471_v53, %v360_v50 }
 0x1ca   :  { %v480_v56 = vmax.f32 %v472_v54, 0.0 }
 0x1cc   :  { %v483_v57 = vpack.c.bf16 %v480_v56, %v479_v55 }
 0x1cd   :  { %v1309_v58 = vpop.f32.mrf.mxu3 }
 0x1ce   :  { %558 = vmatmul.bf16.vlgmr.msrb.gmra.mxu1 %v483_v57  ;;  %v453_v45 = vadd.f32 %v1309_v58, %v359_v36 }
 0x1d5   :  { %v1311_v60 = vpop.f32.mrf.mxu3 }
 0x1d6   :  { %v456_v56 = vadd.f32 %v1311_v60, %v359_v36 }
 0x1dd   :  { %v1313_v63 = vpop.f32.mrf.mxu3 }
 0x1de   :  { %v458_v62 = vadd.f32 %v1313_v63, %v359_v36 }
 0x1e5   :  { %v474_v1 = vpop.f32.mrf.mxu3 }
 0x1e6   :  { %v475_v2 = vadd.f32 %v474_v1, %v360_v50 }
 0x1e8   :  { %v481_v5 = vmax.f32 %v475_v2, 0.0 }
 0x1ed   :  { %v476_v3 = vpop.f32.mrf.mxu3 }
 0x1ee   :  { %v477_v4 = vadd.f32 %v476_v3, %v360_v50 }
 0x1f0   :  { %v482_v6 = vmax.f32 %v477_v4, 0.0 }
 0x1f2   :  { %v484_v7 = vpack.c.bf16 %v482_v6, %v481_v5 }
 0x1f4   :  { %563 = vmatmul.bf16.gmra.mxu1 %v484_v7 }
 0x24b   :  { %v559_v12 = vpop.f32.mrf.mxu1 }
 0x24c   :  { %v560_v15 = vadd.f32 %v559_v12, %v501_v14 }
 0x24e   :  { %v569_v18 = vmax.f32 %v560_v15, 0.0 }
 0x253   :  { %v561_v16 = vpop.f32.mrf.mxu1 }
 0x254   :  { %v562_v17 = vadd.f32 %v561_v16, %v501_v14 }
 0x256   :  { %v570_v19 = vmax.f32 %v562_v17, 0.0 }
 0x258   :  { %v573_v20 = vpack.c.bf16 %v570_v19, %v569_v18 }
 0x25a   :  { %648 = vmatmul.bf16.vlgmr.msrb.gmra.mxu2 %v573_v20 }
 0x271   :  { %v564_v21 = vpop.f32.mrf.mxu1 }
 0x272   :  { %v565_v22 = vadd.f32 %v564_v21, %v501_v14 }
 0x274   :  { %v571_v25 = vmax.f32 %v565_v22, 0.0 }
 0x279   :  { %v566_v23 = vpop.f32.mrf.mxu1 }
 0x27a   :  { %v567_v24 = vadd.f32 %v566_v23, %v501_v14 }
 0x27c   :  { %v572_v26 = vmax.f32 %v567_v24, 0.0 }
 0x27e   :  { %v574_v27 = vpack.c.bf16 %v572_v26, %v571_v25 }
 0x280   :  { %653 = vmatmul.bf16.gmra.mxu2 %v574_v27 }
 0x2dd   :  { %v649_v29 = vpop.f32.mrf.mxu2 }
 0x2de   :  { %v650_v30 = vadd.f32 %v649_v29, %v591_v28 }
 0x2e0   :  { %v659_v31 = vmul.f32 0.5, %v650_v30 }
 0x2e2   :  { %1002 = vtanh.f32 %v659_v31 }
 0x2e5   :  { %v651_v33 = vpop.f32.mrf.mxu2 }
 0x2e6   :  { %v652_v35 = vadd.f32 %v651_v33, %v591_v28 }
 0x2e8   :  { %v1003_v37 = vpop.eup %1002  ;;  %v660_v38 = vmul.f32 0.5, %v652_v35 }
 0x2e9   :  { %v667_v39 = vadd.f32 1.0, %v1003_v37 }
 0x2ea   :  { %1004 = vtanh.f32 %v660_v38 }
 0x2eb   :  { %v671_v41 = vmul.f32 0.5, %v667_v39 }
 0x2ed   :  { %v678_v42 = vsel %vm677_vm0, %v451_v40, %v671_v41 }
 0x2ee   :  { %682 = vst [vmem:[%s1347_s9] sm:$0xff] %v678_v42 }
 0x2f0   :  { %v1005_v43 = vpop.eup %1004 }
 0x2f1   :  { %v668_v44 = vadd.f32 1.0, %v1005_v43 }
 0x2f3   :  { %v672_v46 = vmul.f32 0.5, %v668_v44 }
 0x2f5   :  { %v679_v47 = vsel %vm677_vm0, %v453_v45, %v672_v46 }
 0x2f6   :  { %683 = vst [vmem:[%s1347_s9 + $0x8] sm:$0xff] %v679_v47 }
 0x303   :  { %v654_v48 = vpop.f32.mrf.mxu2 }
 0x304   :  { %v655_v49 = vadd.f32 %v654_v48, %v591_v28 }
 0x306   :  { %v661_v50 = vmul.f32 0.5, %v655_v49 }
 0x308   :  { %1006 = vtanh.f32 %v661_v50 }
 0x30b   :  { %v656_v51 = vpop.f32.mrf.mxu2 }
 0x30c   :  { %v657_v52 = vadd.f32 %v656_v51, %v591_v28 }
 0x30e   :  { %v1007_v53 = vpop.eup %1006  ;;  %v662_v54 = vmul.f32 0.5, %v657_v52 }
 0x30f   :  { %v669_v55 = vadd.f32 1.0, %v1007_v53 }
 0x310   :  { %1008 = vtanh.f32 %v662_v54 }
 0x311   :  { %v673_v57 = vmul.f32 0.5, %v669_v55 }
 0x313   :  { %v680_v58 = vsel %vm677_vm0, %v456_v56, %v673_v57 }
 0x314   :  { %684 = vst [vmem:[%s1347_s9 + $0x10] sm:$0xff] %v680_v58 }
 0x316   :  { %v1009_v59 = vpop.eup %1008 }
 0x317   :  { %v670_v61 = vadd.f32 1.0, %v1009_v59 }
 0x319   :  { %v674_v0 = vmul.f32 0.5, %v670_v61 }
 0x31b   :  { %v681_v1 = vsel %vm677_vm0, %v458_v62, %v674_v0 }
 0x31c   :  { %685 = vst [vmem:[%s1347_s9 + $0x18] sm:$0xff] %v681_v1 }
 0x31d   :  { %690 = vsyncpa [#allocation3], 1 }

</bundles_post_ra>
